<compile_context>
chip_gen: v5e
topology: v5e:2x2
jax: 0.10.0
libtpu: 0.0.40
codegen_flags: <defaults>
</compile_context>

<pallas_src>
import jax
import jax.numpy as jnp
from jax.experimental import pallas as pl
from jax.experimental.pallas import tpu as pltpu


# --------------------------------------------------------------------------
# Kernel
# --------------------------------------------------------------------------
def _mamba_fused_kernel(xs_ref, w_ref, wo_ref, bo_ref, y_ref, hnext_ref):
    # One stacked MXU matmul: h@a + x@Wc + event*b + bc, f32 accumulate.
    h_next = jnp.dot(xs_ref[...], w_ref[...],
                     preferred_element_type=jnp.float32)
    hnext_ref[...] = h_next.astype(hnext_ref.dtype)

    # TODO(synk): nn.Dropout(0.2) omitted (eval / inference mode -> identity).

    # fc_output: Linear(hidden_dim, 1) + Sigmoid.
    # N=1 matmul would waste an entire MXU pass, so do a VPU multiply +
    # XLU lane reduce instead; bias scalar comes from SMEM.
    logits = jnp.sum(h_next * wo_ref[...], axis=-1, keepdims=True) + bo_ref[0, 0]
    y_ref[...] = jax.nn.sigmoid(logits).astype(y_ref.dtype)


# --------------------------------------------------------------------------
# Wrapper
# --------------------------------------------------------------------------
def _pick_batch_tile(batch):
    for tb in (512, 256, 128, 64, 32, 16, 8):
        if batch % tb == 0:
            return tb
    return batch  # full-array block (allowed even if not a multiple of 8)


def _padded_tile_bytes(rows, cols, dtype):
    r = -(-max(rows, 1) // 8) * 8
    c = -(-max(cols, 1) // 128) * 128
    return r * c * jnp.dtype(dtype).itemsize


def mamba_extended_forward(x, h, event, params, *, batch_tile=None):
    """x: (B, input_dim), h: (B, hidden_dim), event: (B,). Returns (y_pred, h_next)."""
    B, input_dim = x.shape
    hidden_dim = h.shape[1]
    K = hidden_dim + input_dim + 2  # stacked contraction dim

    # ---- build stacked operands (layout plumbing, done once per call) ----
    event2d = event.reshape(B, 1).astype(jnp.float32)
    ones = jnp.ones((B, 1), jnp.float32)
    x_stack = jnp.concatenate(
        [h.astype(jnp.float32), x.astype(jnp.float32), event2d, ones], axis=1
    ).astype(jnp.bfloat16)                                       # (B, K)

    w_stack = jnp.concatenate(
        [params["a"], params["wc"], params["b"], params["bc"]], axis=0
    ).astype(jnp.bfloat16)                                       # (K, H)
    wo_row = params["wo"].reshape(1, hidden_dim).astype(jnp.float32)  # (1, H)
    bo = params["bo"].reshape(1, 1).astype(jnp.float32)               # (1, 1) -> SMEM

    # ---- grid / tiling over batch ----
    tb = _pick_batch_tile(B) if batch_tile is None else batch_tile
    grid = (B // tb,)

    # ---- VMEM budget (double-buffered batch tiles + resident weights) ----
    vmem_est = (
        2 * (_padded_tile_bytes(tb, K, jnp.bfloat16)
             + _padded_tile_bytes(tb, hidden_dim, jnp.float32)
             + _padded_tile_bytes(tb, 1, jnp.float32))
        + 2 * _padded_tile_bytes(K, hidden_dim, jnp.bfloat16)
        + 2 * _padded_tile_bytes(1, hidden_dim, jnp.float32)
    )
    vmem_limit = int(min(100 * 1024 * 1024, max(16 * 1024 * 1024, 2 * vmem_est)))

    cost = pl.CostEstimate(
        flops=2 * B * K * hidden_dim + 3 * B * hidden_dim,
        transcendentals=B,
        bytes_accessed=(x_stack.size * 2 + w_stack.size * 2
                        + wo_row.size * 4 + 4
                        + B * hidden_dim * 4 + B * 4),
    )

    y_pred, h_next = pl.pallas_call(
        _mamba_fused_kernel,
        out_shape=(
            jax.ShapeDtypeStruct((B, 1), jnp.float32),
            jax.ShapeDtypeStruct((B, hidden_dim), jnp.float32),
        ),
        grid=grid,
        in_specs=[
            pl.BlockSpec((tb, K), lambda i: (i, 0)),              # X_stack (tiled)
            pl.BlockSpec((K, hidden_dim), lambda i: (0, 0)),      # W_stack (resident)
            pl.BlockSpec((1, hidden_dim), lambda i: (0, 0)),      # wo row  (resident)
            pl.BlockSpec(memory_space=pltpu.MemorySpace.SMEM),    # bo scalar
        ],
        out_specs=(
            pl.BlockSpec((tb, 1), lambda i: (i, 0)),              # y_pred
            pl.BlockSpec((tb, hidden_dim), lambda i: (i, 0)),     # h_next
        ),
        compiler_params=pltpu.CompilerParams(
            dimension_semantics=("parallel",),
            vmem_limit_bytes=vmem_limit,
        ),
        cost_estimate=cost,
    )(x_stack, w_stack, wo_row, bo)
    return y_pred, h_next


# --------------------------------------------------------------------------
# Parameter init (matches PyTorch module) and pure-JAX reference
# --------------------------------------------------------------------------
def init_params(key, input_dim, hidden_dim):
    k = jax.random.split(key, 6)
    # torch.rand -> uniform [0, 1)
    a = jax.random.uniform(k[0], (hidden_dim, hidden_dim), jnp.float32)
    b = jax.random.uniform(k[1], (1, hidden_dim), jnp.float32)
    # nn.Linear(input_dim, hidden_dim): stored transposed as (in, out)
    lim_c = 1.0 / jnp.sqrt(input_dim)
    wc = jax.random.uniform(k[2], (input_dim, hidden_dim), jnp.float32,
                            minval=-lim_c, maxval=lim_c)
    bc = jax.random.uniform(k[3], (1, hidden_dim), jnp.float32,
                            minval=-lim_c, maxval=lim_c)
    # nn.Linear(hidden_dim, 1): stored transposed as (in, out)
    lim_o = 1.0 / jnp.sqrt(hidden_dim)
    wo = jax.random.uniform(k[4], (hidden_dim, 1), jnp.float32,
                            minval=-lim_o, maxval=lim_o)
    bo = jax.random.uniform(k[5], (1, 1), jnp.float32,
                            minval=-lim_o, maxval=lim_o)
    return {"a": a, "b": b, "wc": wc, "bc": bc, "wo": wo, "bo": bo}


def reference_forward(x, h, event, p):
    event_effect = p["b"] * event[:, None]
    h_next = h @ p["a"] + event_effect + (x @ p["wc"] + p["bc"])
    y = jax.nn.sigmoid(h_next @ p["wo"] + p["bo"])
    return y, h_next


# --------------------------------------------------------------------------
# Self-test
# --------------------------------------------------------------------------
if __name__ == "__main__":
    B, input_dim, hidden_dim = 8, 16, 32
    key = jax.random.PRNGKey(0)
    kx, kh, ke, kp = jax.random.split(key, 4)

    x = jax.random.normal(kx, (B, input_dim), jnp.float32)
    h = jax.random.normal(kh, (B, hidden_dim), jnp.float32)
    event = jax.random.normal(ke, (B,), jnp.float32)
    params = init_params(kp, input_dim, hidden_dim)

    y_pred, h_next = mamba_extended_forward(x, h, event, params)
    jax.block_until_ready((y_pred, h_next))

    y_ref, h_ref = reference_forward(x, h, event, params)
    assert y_pred.shape == (B, 1) and h_next.shape == (B, hidden_dim)
    # bf16 MXU inputs with f32 accumulation -> loosened tolerance vs f32 reference.
    assert jnp.allclose(h_next, h_ref, atol=5e-2, rtol=5e-2), (
        "h_next max abs err = %f" % float(jnp.max(jnp.abs(h_next - h_ref))))
    assert jnp.allclose(y_pred, y_ref, atol=2e-2, rtol=2e-2), (
        "y_pred max abs err = %f" % float(jnp.max(jnp.abs(y_pred - y_ref))))

    print("KERNEL_OK")
</pallas_src>

<mosaic_0001>
module attributes {stable_mosaic.version = 11 : i64} {
  func.func @_mamba_fused_kernel(%arg0: i32, %arg1: memref<8x50xbf16, #tpu.memory_space<vmem>>, %arg2: memref<50x32xbf16, #tpu.memory_space<vmem>>, %arg3: memref<1x32xf32, #tpu.memory_space<vmem>>, %arg4: memref<1x1xf32, #tpu.memory_space<smem>>, %arg5: memref<8x1xf32, #tpu.memory_space<vmem>>, %arg6: memref<8x32xf32, #tpu.memory_space<vmem>>) attributes {dimension_semantics = [#tpu.dimension_semantics<parallel>], iteration_bounds = array<i64: 1>, scalar_prefetch = 0 : i64, scratch_operands = 0 : i64, tpu.core_type = #tpu.core_type<tc>, window_params = [{transform_indices = @transform_0, window_bounds = array<i64: 8, 50>}, {pipeline_mode = #tpu.pipeline_mode<synchronous>, transform_indices = @transform_1, window_bounds = array<i64: 50, 32>}, {pipeline_mode = #tpu.pipeline_mode<synchronous>, transform_indices = @transform_2, window_bounds = array<i64: 1, 32>}, {transform_indices = @transform_3, window_bounds = array<i64: 1, 1>}, {transform_indices = @transform_4, window_bounds = array<i64: 8, 1>}, {transform_indices = @transform_5, window_bounds = array<i64: 8, 32>}]} {
    %c0 = arith.constant 0 : index
    %c0_0 = arith.constant 0 : index
    %0 = vector.load %arg1[%c0, %c0_0] : memref<8x50xbf16, #tpu.memory_space<vmem>>, vector<8x50xbf16>
    %c0_1 = arith.constant 0 : index
    %c0_2 = arith.constant 0 : index
    %1 = vector.load %arg2[%c0_1, %c0_2] : memref<50x32xbf16, #tpu.memory_space<vmem>>, vector<50x32xbf16>
    %cst = arith.constant dense<0.000000e+00> : vector<8x32xf32>
    %2 = tpu.matmul %0, %1, %cst {dimension_numbers = #tpu.dot_dimension_numbers<[1], [0], [0], [1], [0, 0, 1, 1], [], []>} : vector<8x50xbf16>, vector<50x32xbf16>, vector<8x32xf32> -> vector<8x32xf32>
    %c0_3 = arith.constant 0 : index
    %c0_4 = arith.constant 0 : index
    %3 = vector.load %arg6[%c0_3, %c0_4] : memref<8x32xf32, #tpu.memory_space<vmem>>, vector<8x32xf32>
    tpu.vector_store %arg6[%c0_3, %c0_4], %2 {strides = array<i32>} : memref<8x32xf32, #tpu.memory_space<vmem>>, vector<8x32xf32>,
    %c0_5 = arith.constant 0 : index
    %c0_6 = arith.constant 0 : index
    %4 = vector.load %arg3[%c0_5, %c0_6] : memref<1x32xf32, #tpu.memory_space<vmem>>, vector<1x32xf32>
    %5 = vector.broadcast %4 : vector<1x32xf32> to vector<8x32xf32>
    %6 = arith.mulf %2, %5 : vector<8x32xf32>
    %cst_7 = arith.constant dense<0.000000e+00> : vector<8xf32>
    %7 = vector.multi_reduction <add>, %6, %cst_7 [1] : vector<8x32xf32> to vector<8xf32>
    %8 = vector.shape_cast %7 : vector<8xf32> to vector<8x1xf32>
    %c0_8 = arith.constant 0 : index
    %c0_9 = arith.constant 0 : index
    %9 = memref.load %arg4[%c0_8, %c0_9] : memref<1x1xf32, #tpu.memory_space<smem>>
    %10 = vector.broadcast %9 : f32 to vector<8x1xf32>
    %11 = arith.addf %8, %10 : vector<8x1xf32>
    %12 = arith.negf %11 : vector<8x1xf32>
    %13 = math.exp %12 : vector<8x1xf32>
    %cst_10 = arith.constant 1.000000e+00 : f32
    %14 = vector.broadcast %cst_10 : f32 to vector<8x1xf32>
    %15 = arith.addf %14, %13 : vector<8x1xf32>
    %16 = arith.divf %14, %15 : vector<8x1xf32>
    %c0_11 = arith.constant 0 : index
    %c0_12 = arith.constant 0 : index
    %17 = vector.load %arg5[%c0_11, %c0_12] : memref<8x1xf32, #tpu.memory_space<vmem>>, vector<8x1xf32>
    tpu.vector_store %arg5[%c0_11, %c0_12], %16 {strides = array<i32>} : memref<8x1xf32, #tpu.memory_space<vmem>>, vector<8x1xf32>,
    return
  }
  func.func @transform_0(%arg0: i32) -> (i32, i32) {
    %c0_i32 = arith.constant 0 : i32
    %c0_i32_0 = arith.constant 0 : i32
    return %arg0, %c0_i32 : i32, i32
  }
  func.func @transform_1(%arg0: i32) -> (i32, i32) {
    %c0_i32 = arith.constant 0 : i32
    %c0_i32_0 = arith.constant 0 : i32
    %c0_i32_1 = arith.constant 0 : i32
    return %c0_i32, %c0_i32_0 : i32, i32
  }
  func.func @transform_2(%arg0: i32) -> (i32, i32) {
    %c0_i32 = arith.constant 0 : i32
    %c0_i32_0 = arith.constant 0 : i32
    %c0_i32_1 = arith.constant 0 : i32
    return %c0_i32, %c0_i32_0 : i32, i32
  }
  func.func @transform_3(%arg0: i32) -> (i32, i32) {
    %c0_i32 = arith.constant 0 : i32
    %c0_i32_0 = arith.constant 0 : i32
    %c0_i32_1 = arith.constant 0 : i32
    return %c0_i32, %c0_i32_0 : i32, i32
  }
  func.func @transform_4(%arg0: i32) -> (i32, i32) {
    %c0_i32 = arith.constant 0 : i32
    %c0_i32_0 = arith.constant 0 : i32
    return %arg0, %c0_i32 : i32, i32
  }
  func.func @transform_5(%arg0: i32) -> (i32, i32) {
    %c0_i32 = arith.constant 0 : i32
    %c0_i32_0 = arith.constant 0 : i32
    return %arg0, %c0_i32 : i32, i32
  }
}

</mosaic_0001>

<bundles_post_ra>
// kernel: tpu_custom_call.1
= control target key start
LH: loop header
LB: loop body
LE: loop exit
PB: predicated region body
PF: predicated region fallthrough
CT: control target
= control target key end

     0   :  { %vm55_vm0 = vcmask 1040384   ;;  %s233_s0 = inlined_call_operand.vmem [shape: bf16[8,50], index: 0, kind: input, shape index: {}]   ;;  %s234_s1 = inlined_call_operand.vmem [shape: bf16[50,32], index: 1, kind: input, shape index: {}]   ;;  %s235_s2 = inlined_call_operand.vmem [shape: f32[1,32], index: 2, kind: input, shape index: {}]   ;;  %s236_s3 = inlined_call_operand.<no memory space> [shape: f32[1,1], index: 3, kind: input, shape index: {}]   ;;  %s237_s4 = inlined_call_operand.vmem [shape: f32[8,1], index: 4, kind: output, shape index: {0}]   ;;  %s238_s5 = inlined_call_operand.hbm [shape: f32[8,32], index: 5, kind: output, shape index: {1}]  }
   0x1   :  { %v29_v0 = vld [vmem:[%s234_s1 + $0x18] sm:$0x1] }
   0x2   :  { %v43_v1 = vunpack.c.l.b16 %v29_v0 }
   0x3   :  { %12 = vsyncpa [#allocation4], 0  ;;  %v142_v4 = vld [vmem:[%s234_s1 + $0x10] sm:$0xff]  ;;  %v141_v5 = vld [vmem:[%s234_s1 + $0x8] sm:$0xff]  ;;  %vm51_vm1 = vcmask 408576   ;;  %vm72_vm2 = vcmask 261120   ;;  %v83_v13 = vstv %s236_s3 }
   0x4   :  { %v47_v2 = vpack.c.b16 %v43_v1, %v43_v1  ;;  %v140_v6 = vld [vmem:[%s234_s1] sm:$0xff]  ;;  %s175_s30 = smov [#allocation3]   ;;  %s115_s8 = sshll.u32 %s238_s5, 4  ;;  %vm104_vm6 = vcmask 7168   ;;  %s116_s8 = int_to_ptr.hbm [resolvable:$true] %s115_s8 }
   0x5   :  { %v22_v7 = vld [vmem:[%s233_s0] sm:$0xf]  ;;  %s113_s1 = sshll.u32 %s175_s30, 4  ;;  %s114_s1 = int_to_ptr.vmem [resolvable:$true] %s113_s1 }
   0x6   :  { %v57_v3 = vsel %vm55_vm0, %v47_v2, 0  ;;  %v144_v8 = vld [vmem:[%s235_s2] ss:$0 sm:$0xff] }
   0x7   :  { %63 = vmatpush.bf16.msra.mxu0 %v57_v3 }
   0xb   :  { %64 = vmatpush.bf16.msra.mxu0 %v142_v4 }
   0xf   :  { %65 = vmatpush.bf16.msra.mxu0 %v141_v5 }
  0x13   :  { %66 = vmatpush.bf16.msra.mxu0 %v140_v6 }
  0x16   :  { %138 = vmatmul.msk.bf16.vlgmr.msra.gmra.mxu0 %vm51_vm1, %v22_v7 }
  0x93   :  { %v68_v9 = vpop.f32.mrf.mxu0 }
  0x94   :  { %73 = vst.msk [vmem:[#allocation3] sm:$0xff] %vm72_vm2, %v68_v9  ;;  %v78_v10 = vmul.f32 %v144_v8, %v68_v9 }
  0x95   :  { %118 = dma.vmem_to_hbm [thread:$0]  %s114_s1, 128, %s116_s8, [#allocation4]  }
  0x96   :  { %v79_v11 = vsel %vm72_vm2, %v78_v10, 0.0 }
  0x97   :  { %80 = vadd.xlane.f32.xlu0 %v79_v11 }
  0x9b   :  { %v70_v12 = vpop.f32.mrf.mxu0 }
 0x10a   :  { %v81_v14 = vpop.xlane.xlu0 %80 }
 0x10b   :  { %v84_v15 = vadd.f32 %v83_v13, %v81_v14 }
 0x10d   :  { %v139_v16 = vmul.f32 -1.442695, %v84_v15 }
 0x10f   :  { %145 = vpow2.f32 %v139_v16 }
 0x115   :  { %v146_v17 = vpop.eup %145 }
 0x116   :  { %v88_v18 = vadd.f32 1.0, %v146_v17 }
 0x118   :  { %147 = vrcp.f32 %v88_v18  ;;  %v100_v22 = vand.u32 2147483648, %v88_v18  ;;  %v98_v24 = vand.u32 2147483647, %v88_v18  ;;  %vm94_vm4 = vweird.f32 %v88_v18 }
 0x11a   :  { %v101_v26 = vor.u32 1.1754944e-38, %v100_v22  ;;  %vm99_vm7 = vcmp.eq.f32.partialorder %v98_v24, 8.507059e+37 }
 0x11e   :  { %v148_v19 = vpop.eup %147 }
 0x11f   :  { %v90_v20 = vmul.f32 %v148_v19, %v88_v18  ;;  %vm95_vm3 = vweird.f32 %v148_v19 }
 0x120   :  { %vm96_vm5 = vmor %vm94_vm4, %vm95_vm3 }
 0x121   :  { %v91_v21 = vsub.f32 1.0, %v90_v20 }
 0x123   :  { %v92_v23 = vmul.f32 %v148_v19, %v91_v21 }
 0x125   :  { %v93_v25 = vadd.f32 %v148_v19, %v92_v23 }
 0x127   :  { %v97_v27 = vsel %vm96_vm5, %v148_v19, %v93_v25 }
 0x128   :  { %v102_v28 = vsel %vm99_vm7, %v101_v26, %v97_v27 }
 0x129   :  { %105 = vst.msk [vmem:[%s237_s4] sm:$0xff] %vm104_vm6, %v102_v28 }
 0x12a   :  { %173 = dma.done.wait [#allocation4], 128  }
 0x12b   :  { %174 = vsyncadd [#allocation4], 4294967168 }
 0x12c   :  { %125 = vsyncpa [#allocation4], 1 }

</bundles_post_ra>
